<compile_context>
chip_gen: v5e
topology: v5e:2x2
jax: 0.10.0
libtpu: 0.0.40
codegen_flags: <defaults>
</compile_context>

<pallas_src>
import jax
import jax.numpy as jnp
from jax.experimental import pallas as pl
from jax.experimental.pallas import tpu as pltpu

VMEM_SPEC = pl.BlockSpec(memory_space=pltpu.MemorySpace.VMEM)


# ---------------- fused Pallas kernel ----------------

def make_fused_kernel(node_specs, graph_specs, fc_spec, nodes_per_graph, n_graphs):
    """Fused forward. Each spec is (w_off, w_rows, f_out, b_off): static offsets into
    the single f32 parameter slab (all 8-row aligned)."""

    def conv_relu(adj_bf16, h_f32, p_ref, spec):
        w_off, w_rows, f_out, b_off = spec
        # (A @ h) first: keeps the N x N contraction at width f_in. bf16 MXU operands,
        # f32 accumulation.
        agg = jnp.dot(adj_bf16, h_f32.astype(jnp.bfloat16),
                      preferred_element_type=jnp.float32)
        # single dot against pre-stacked W_cat = [[W_rel],[W_root]]
        z = jnp.concatenate([agg, h_f32], axis=1).astype(jnp.bfloat16)
        w = p_ref[pl.ds(w_off, w_rows), :f_out].astype(jnp.bfloat16)
        y = jnp.dot(z, w, preferred_element_type=jnp.float32)
        y = y + p_ref[pl.ds(b_off, 1), :f_out]           # bias add in f32 (VPU)
        return jnp.maximum(y, 0.0)                       # ReLU in f32

    def kernel(x_ref, nadj_ref, gadj_ref, p_ref, o_ref):
        # ---- node-level GraphConv stack (+ ReLU after every layer) ----
        nadj = nadj_ref[...]                             # bf16, 0/1 exact
        h = x_ref[...].astype(jnp.float32)
        for spec in node_specs:
            h = conv_relu(nadj, h, p_ref, spec)

        # ---- global_mean_pool: nodes stored contiguously graph-by-graph ----
        feat = h.shape[1]
        pooled = jnp.mean(h.reshape(n_graphs, nodes_per_graph, feat), axis=1)

        # ---- graph-level GraphConv stack (+ ReLU) ----
        gadj = gadj_ref[...]
        g = pooled
        for spec in graph_specs:
            g = conv_relu(gadj, g, p_ref, spec)

        # ---- FC head (Linear∘Linear pre-collapsed offline) + sigmoid ----
        w_off, w_rows, f_out, b_off = fc_spec
        w_fc = p_ref[pl.ds(w_off, w_rows), :f_out].astype(jnp.bfloat16)
        logit = (jnp.dot(g.astype(jnp.bfloat16), w_fc,
                         preferred_element_type=jnp.float32)
                 + p_ref[pl.ds(b_off, 1), :f_out])
        sig = jax.nn.sigmoid(logit)                      # (n_graphs, 1), f32
        # lane-dense (unmasked) store; wrapper slices lane 0.
        o_ref[...] = jnp.broadcast_to(sig, o_ref.shape)

    return kernel


# ---------------- parameter packing (construction-time, plain JAX) ----------------

def pack_params(layers, max_out):
    """layers: list of (W, bias) f32 pairs. Returns (slab_f32 [rows, max_out], specs)
    where specs[i] = (w_off, w_rows, f_out, b_off); all offsets 8-row aligned."""
    blocks, specs, off = [], [], 0

    def pad_block(a, rows_to):
        return jnp.pad(a, ((0, rows_to - a.shape[0]), (0, max_out - a.shape[1])))

    for (w, b) in layers:
        w_rows_pad = -(-w.shape[0] // 8) * 8
        blocks.append(pad_block(w, w_rows_pad))
        w_off = off
        off += w_rows_pad
        blocks.append(pad_block(b, 8))
        b_off = off
        off += 8
        specs.append((w_off, w.shape[0], w.shape[1], b_off))
    return jnp.concatenate(blocks, axis=0).astype(jnp.float32), specs


def _cost_estimate(n_nodes, n_graphs, node_specs, graph_specs, fc_spec, bytes_accessed):
    flops = 0
    for (_, w_rows, f_out, _) in node_specs:
        f_in = w_rows // 2
        flops += 2 * n_nodes * n_nodes * f_in + 2 * n_nodes * w_rows * f_out
    flops += n_nodes * node_specs[-1][2]                      # mean pool
    for (_, w_rows, f_out, _) in graph_specs:
        f_in = w_rows // 2
        flops += 2 * n_graphs * n_graphs * f_in + 2 * n_graphs * w_rows * f_out
    flops += 2 * n_graphs * fc_spec[1] * fc_spec[2]           # collapsed FC
    return pl.CostEstimate(flops=flops, transcendentals=n_graphs * fc_spec[2],
                           bytes_accessed=int(bytes_accessed))


def build_fixed_gig_forward(node_adj, graph_adj, node_params, graph_params, fc1, fc2):
    """Builds forward(x) -> (B,) sigmoid probs; all packing/casting done once here."""
    n_nodes = node_adj.shape[0]
    n_graphs = graph_adj.shape[0]
    assert n_nodes % n_graphs == 0, \
        "nodes must be stored contiguously graph-by-graph with equal counts"
    nodes_per_graph = n_nodes // n_graphs

    # FC head is Linear -> Linear (no activation between, exactly as the torch module
    # builds it for a single classif_fc entry) -> collapse into one affine offline.
    fc1_w, fc1_b = fc1
    fc2_w, fc2_b = fc2
    fc_w = fc1_w @ fc2_w
    fc_b = fc1_b @ fc2_w + fc2_b

    layers = list(node_params) + list(graph_params) + [(fc_w, fc_b)]
    max_out = max(w.shape[1] for (w, _) in layers)
    slab, specs = pack_params(layers, max_out)
    n_node = len(node_params)
    node_specs = specs[:n_node]
    graph_specs = specs[n_node:-1]
    fc_spec = specs[-1]

    nadj16 = node_adj.astype(jnp.bfloat16)    # 0/1 entries: exact in bf16
    gadj16 = graph_adj.astype(jnp.bfloat16)
    out_lanes = 128

    f_in0 = node_specs[0][1] // 2
    bytes_accessed = (n_nodes * f_in0 * 2 + n_nodes * n_nodes * 2
                      + n_graphs * n_graphs * 2 + int(slab.size) * 4
                      + n_graphs * out_lanes * 4)

    kernel = make_fused_kernel(node_specs, graph_specs, fc_spec,
                               nodes_per_graph, n_graphs)

    call = pl.pallas_call(
        kernel,
        out_shape=jax.ShapeDtypeStruct((n_graphs, out_lanes), jnp.float32),
        in_specs=[VMEM_SPEC] * 4,
        out_specs=VMEM_SPEC,
        cost_estimate=_cost_estimate(n_nodes, n_graphs, node_specs, graph_specs,
                                     fc_spec, bytes_accessed),
    )

    def forward(x):
        out = call(x.astype(jnp.bfloat16), nadj16, gadj16, slab)
        return out[:, 0]          # sigmoid(x.view(-1)) of the torch code

    return forward


# ---------------- parameter construction (plain JAX glue) ----------------

def linear_params(key, fan_in, fan_out, bias=True):
    """PyTorch-default-style uniform init, deterministic via PRNG key."""
    k_w, k_b = jax.random.split(key)
    bound = 1.0 / (fan_in ** 0.5)
    w = jax.random.uniform(k_w, (fan_in, fan_out), jnp.float32, -bound, bound)
    b = (jax.random.uniform(k_b, (1, fan_out), jnp.float32, -bound, bound)
         if bias else None)
    return w, b


def graph_conv_params(key, fan_in, fan_out):
    """PyG GraphConv params, pre-stacked: W_cat = [[W_rel],[W_root]] (2*f_in, f_out)."""
    k_rel, k_root = jax.random.split(key)
    w_rel, b_rel = linear_params(k_rel, fan_in, fan_out, bias=True)    # lin_rel (bias)
    w_root, _ = linear_params(k_root, fan_in, fan_out, bias=False)     # lin_root (no bias)
    w_cat = jnp.concatenate([w_rel, w_root], axis=0)   # rows 0:f_in -> agg, f_in: -> x
    return w_cat, b_rel


# ---------------- example / driver ----------------

def ring_adj(n):
    a = jnp.zeros((n, n), jnp.float32)
    idx = jnp.arange(n)
    a = a.at[idx, (idx + 1) % n].set(1.0)
    a = a.at[(idx + 1) % n, idx].set(1.0)
    return a


if __name__ == "__main__":
    # config (synthetic, deterministic):
    #   num_node_features=8, node_conv_size=[32,32], graph_conv_size=[32,32],
    #   classif_fc=[16], output_dim=2 (-> 1 logit + sigmoid),
    #   pooling='mean', node_level_module='GraphConv', use_dropout=False
    B = 16                # number of graphs (graph-level nodes) -> 128 node rows total
    NODES_PER_GRAPH = 8   # multiple of 8 -> clean sublane reduce for mean pooling
    F_IN = 8
    NODE_CONV_SIZE = [32, 32]
    GRAPH_CONV_SIZE = [32, 32]
    CLASSIF_FC = [16]
    OUT_DIM = 1           # output_dim==2 -> output_dim-1

    N = B * NODES_PER_GRAPH

    key = jax.random.PRNGKey(0)
    key, kx = jax.random.split(key)
    x = jax.random.normal(kx, (N, F_IN), jnp.float32)

    # node-level graph: undirected ring within each graph, block-diagonal over graphs
    node_adj = jnp.kron(jnp.eye(B, dtype=jnp.float32), ring_adj(NODES_PER_GRAPH))
    # graph-level graph: undirected ring over the B graphs (the fixed edge_index)
    graph_adj = ring_adj(B)

    node_params = []
    fan_in = F_IN
    for size in NODE_CONV_SIZE:
        key, k = jax.random.split(key)
        node_params.append(graph_conv_params(k, fan_in, size))
        fan_in = size

    graph_params = []
    fan_in = NODE_CONV_SIZE[-1]
    for size in GRAPH_CONV_SIZE:
        key, k = jax.random.split(key)
        graph_params.append(graph_conv_params(k, fan_in, size))
        fan_in = size

    key, k1 = jax.random.split(key)
    fc1 = linear_params(k1, GRAPH_CONV_SIZE[-1], CLASSIF_FC[0], bias=True)
    key, k2 = jax.random.split(key)
    fc2 = linear_params(k2, CLASSIF_FC[-1], OUT_DIM, bias=True)

    forward = build_fixed_gig_forward(node_adj, graph_adj, node_params,
                                      graph_params, fc1, fc2)
    fwd = jax.jit(forward)

    out = fwd(x)
    jax.block_until_ready(out)
    assert out.shape == (B,)
    assert bool(jnp.all((out >= 0.0) & (out <= 1.0)))
    print("KERNEL_OK")
</pallas_src>

<mosaic_0001>
module attributes {stable_mosaic.version = 11 : i64} {
  func.func @kernel(%arg0: memref<128x8xbf16, #tpu.memory_space<vmem>>, %arg1: memref<128x128xbf16, #tpu.memory_space<vmem>>, %arg2: memref<16x16xbf16, #tpu.memory_space<vmem>>, %arg3: memref<280x32xf32, #tpu.memory_space<vmem>>, %arg4: memref<16x128xf32, #tpu.memory_space<vmem>>) attributes {dimension_semantics = [], scalar_prefetch = 0 : i64, scratch_operands = 0 : i64, tpu.core_type = #tpu.core_type<tc>} {
    %c0 = arith.constant 0 : index
    %c0_0 = arith.constant 0 : index
    %0 = vector.load %arg1[%c0, %c0_0] : memref<128x128xbf16, #tpu.memory_space<vmem>>, vector<128x128xbf16>
    %c0_1 = arith.constant 0 : index
    %c0_2 = arith.constant 0 : index
    %1 = vector.load %arg0[%c0_1, %c0_2] : memref<128x8xbf16, #tpu.memory_space<vmem>>, vector<128x8xbf16>
    %2 = arith.extf %1 : vector<128x8xbf16> to vector<128x8xf32>
    %3 = arith.truncf %2 : vector<128x8xf32> to vector<128x8xbf16>
    %cst = arith.constant dense<0.000000e+00> : vector<128x8xf32>
    %4 = tpu.matmul %0, %3, %cst {dimension_numbers = #tpu.dot_dimension_numbers<[1], [0], [0], [1], [0, 0, 1, 1], [], []>} : vector<128x128xbf16>, vector<128x8xbf16>, vector<128x8xf32> -> vector<128x8xf32>
    %5 = tpu.concatenate %4, %2 in 1 : vector<128x8xf32>, vector<128x8xf32> -> vector<128x16xf32>
    %6 = arith.truncf %5 : vector<128x16xf32> to vector<128x16xbf16>
    %c0_3 = arith.constant 0 : index
    %c0_4 = arith.constant 0 : index
    %7 = vector.load %arg3[%c0_3, %c0_4] : memref<280x32xf32, #tpu.memory_space<vmem>>, vector<16x32xf32>
    %8 = arith.truncf %7 : vector<16x32xf32> to vector<16x32xbf16>
    %cst_5 = arith.constant dense<0.000000e+00> : vector<128x32xf32>
    %9 = tpu.matmul %6, %8, %cst_5 {dimension_numbers = #tpu.dot_dimension_numbers<[1], [0], [0], [1], [0, 0, 1, 1], [], []>} : vector<128x16xbf16>, vector<16x32xbf16>, vector<128x32xf32> -> vector<128x32xf32>
    %c16 = arith.constant 16 : index
    %c0_6 = arith.constant 0 : index
    %10 = vector.load %arg3[%c16, %c0_6] : memref<280x32xf32, #tpu.memory_space<vmem>>, vector<1x32xf32>
    %11 = vector.broadcast %10 : vector<1x32xf32> to vector<128x32xf32>
    %12 = arith.addf %9, %11 : vector<128x32xf32>
    %cst_7 = arith.constant 0.000000e+00 : f32
    %13 = vector.broadcast %cst_7 : f32 to vector<128x32xf32>
    %14 = arith.maximumf %12, %13 : vector<128x32xf32>
    %15 = arith.truncf %14 : vector<128x32xf32> to vector<128x32xbf16>
    %cst_8 = arith.constant dense<0.000000e+00> : vector<128x32xf32>
    %16 = tpu.matmul %0, %15, %cst_8 {dimension_numbers = #tpu.dot_dimension_numbers<[1], [0], [0], [1], [0, 0, 1, 1], [], []>} : vector<128x128xbf16>, vector<128x32xbf16>, vector<128x32xf32> -> vector<128x32xf32>
    %17 = tpu.concatenate %16, %14 in 1 : vector<128x32xf32>, vector<128x32xf32> -> vector<128x64xf32>
    %18 = arith.truncf %17 : vector<128x64xf32> to vector<128x64xbf16>
    %c24 = arith.constant 24 : index
    %c0_9 = arith.constant 0 : index
    %19 = vector.load %arg3[%c24, %c0_9] : memref<280x32xf32, #tpu.memory_space<vmem>>, vector<64x32xf32>
    %20 = arith.truncf %19 : vector<64x32xf32> to vector<64x32xbf16>
    %cst_10 = arith.constant dense<0.000000e+00> : vector<128x32xf32>
    %21 = tpu.matmul %18, %20, %cst_10 {dimension_numbers = #tpu.dot_dimension_numbers<[1], [0], [0], [1], [0, 0, 1, 1], [], []>} : vector<128x64xbf16>, vector<64x32xbf16>, vector<128x32xf32> -> vector<128x32xf32>
    %c88 = arith.constant 88 : index
    %c0_11 = arith.constant 0 : index
    %22 = vector.load %arg3[%c88, %c0_11] : memref<280x32xf32, #tpu.memory_space<vmem>>, vector<1x32xf32>
    %23 = vector.broadcast %22 : vector<1x32xf32> to vector<128x32xf32>
    %24 = arith.addf %21, %23 : vector<128x32xf32>
    %cst_12 = arith.constant 0.000000e+00 : f32
    %25 = vector.broadcast %cst_12 : f32 to vector<128x32xf32>
    %26 = arith.maximumf %24, %25 : vector<128x32xf32>
    %27 = vector.shape_cast %26 : vector<128x32xf32> to vector<16x8x32xf32>
    %cst_13 = arith.constant dense<0.000000e+00> : vector<16x32xf32>
    %28 = vector.multi_reduction <add>, %27, %cst_13 [1] : vector<16x8x32xf32> to vector<16x32xf32>
    %cst_14 = arith.constant 8.000000e+00 : f32
    %29 = vector.broadcast %cst_14 : f32 to vector<16x32xf32>
    %30 = arith.divf %28, %29 : vector<16x32xf32>
    %c0_15 = arith.constant 0 : index
    %c0_16 = arith.constant 0 : index
    %31 = vector.load %arg2[%c0_15, %c0_16] : memref<16x16xbf16, #tpu.memory_space<vmem>>, vector<16x16xbf16>
    %32 = arith.truncf %30 : vector<16x32xf32> to vector<16x32xbf16>
    %cst_17 = arith.constant dense<0.000000e+00> : vector<16x32xf32>
    %33 = tpu.matmul %31, %32, %cst_17 {dimension_numbers = #tpu.dot_dimension_numbers<[1], [0], [0], [1], [0, 0, 1, 1], [], []>} : vector<16x16xbf16>, vector<16x32xbf16>, vector<16x32xf32> -> vector<16x32xf32>
    %34 = tpu.concatenate %33, %30 in 1 : vector<16x32xf32>, vector<16x32xf32> -> vector<16x64xf32>
    %35 = arith.truncf %34 : vector<16x64xf32> to vector<16x64xbf16>
    %c96 = arith.constant 96 : index
    %c0_18 = arith.constant 0 : index
    %36 = vector.load %arg3[%c96, %c0_18] : memref<280x32xf32, #tpu.memory_space<vmem>>, vector<64x32xf32>
    %37 = arith.truncf %36 : vector<64x32xf32> to vector<64x32xbf16>
    %cst_19 = arith.constant dense<0.000000e+00> : vector<16x32xf32>
    %38 = tpu.matmul %35, %37, %cst_19 {dimension_numbers = #tpu.dot_dimension_numbers<[1], [0], [0], [1], [0, 0, 1, 1], [], []>} : vector<16x64xbf16>, vector<64x32xbf16>, vector<16x32xf32> -> vector<16x32xf32>
    %c160 = arith.constant 160 : index
    %c0_20 = arith.constant 0 : index
    %39 = vector.load %arg3[%c160, %c0_20] : memref<280x32xf32, #tpu.memory_space<vmem>>, vector<1x32xf32>
    %40 = vector.broadcast %39 : vector<1x32xf32> to vector<16x32xf32>
    %41 = arith.addf %38, %40 : vector<16x32xf32>
    %cst_21 = arith.constant 0.000000e+00 : f32
    %42 = vector.broadcast %cst_21 : f32 to vector<16x32xf32>
    %43 = arith.maximumf %41, %42 : vector<16x32xf32>
    %44 = arith.truncf %43 : vector<16x32xf32> to vector<16x32xbf16>
    %cst_22 = arith.constant dense<0.000000e+00> : vector<16x32xf32>
    %45 = tpu.matmul %31, %44, %cst_22 {dimension_numbers = #tpu.dot_dimension_numbers<[1], [0], [0], [1], [0, 0, 1, 1], [], []>} : vector<16x16xbf16>, vector<16x32xbf16>, vector<16x32xf32> -> vector<16x32xf32>
    %46 = tpu.concatenate %45, %43 in 1 : vector<16x32xf32>, vector<16x32xf32> -> vector<16x64xf32>
    %47 = arith.truncf %46 : vector<16x64xf32> to vector<16x64xbf16>
    %c168 = arith.constant 168 : index
    %c0_23 = arith.constant 0 : index
    %48 = vector.load %arg3[%c168, %c0_23] : memref<280x32xf32, #tpu.memory_space<vmem>>, vector<64x32xf32>
    %49 = arith.truncf %48 : vector<64x32xf32> to vector<64x32xbf16>
    %cst_24 = arith.constant dense<0.000000e+00> : vector<16x32xf32>
    %50 = tpu.matmul %47, %49, %cst_24 {dimension_numbers = #tpu.dot_dimension_numbers<[1], [0], [0], [1], [0, 0, 1, 1], [], []>} : vector<16x64xbf16>, vector<64x32xbf16>, vector<16x32xf32> -> vector<16x32xf32>
    %c232 = arith.constant 232 : index
    %c0_25 = arith.constant 0 : index
    %51 = vector.load %arg3[%c232, %c0_25] : memref<280x32xf32, #tpu.memory_space<vmem>>, vector<1x32xf32>
    %52 = vector.broadcast %51 : vector<1x32xf32> to vector<16x32xf32>
    %53 = arith.addf %50, %52 : vector<16x32xf32>
    %cst_26 = arith.constant 0.000000e+00 : f32
    %54 = vector.broadcast %cst_26 : f32 to vector<16x32xf32>
    %55 = arith.maximumf %53, %54 : vector<16x32xf32>
    %c240 = arith.constant 240 : index
    %c0_27 = arith.constant 0 : index
    %56 = vector.load %arg3[%c240, %c0_27] : memref<280x32xf32, #tpu.memory_space<vmem>>, vector<32x1xf32>
    %57 = arith.truncf %56 : vector<32x1xf32> to vector<32x1xbf16>
    %58 = arith.truncf %55 : vector<16x32xf32> to vector<16x32xbf16>
    %cst_28 = arith.constant dense<0.000000e+00> : vector<16x1xf32>
    %59 = tpu.matmul %58, %57, %cst_28 {dimension_numbers = #tpu.dot_dimension_numbers<[1], [0], [0], [1], [0, 0, 1, 1], [], []>} : vector<16x32xbf16>, vector<32x1xbf16>, vector<16x1xf32> -> vector<16x1xf32>
    %c272 = arith.constant 272 : index
    %c0_29 = arith.constant 0 : index
    %60 = vector.load %arg3[%c272, %c0_29] : memref<280x32xf32, #tpu.memory_space<vmem>>, vector<1x1xf32>
    %61 = vector.broadcast %60 : vector<1x1xf32> to vector<16x1xf32>
    %62 = arith.addf %59, %61 : vector<16x1xf32>
    %63 = arith.negf %62 : vector<16x1xf32>
    %64 = math.exp %63 : vector<16x1xf32>
    %cst_30 = arith.constant 1.000000e+00 : f32
    %65 = vector.broadcast %cst_30 : f32 to vector<16x1xf32>
    %66 = arith.addf %65, %64 : vector<16x1xf32>
    %67 = arith.divf %65, %66 : vector<16x1xf32>
    %68 = vector.shape_cast %67 : vector<16x1xf32> to vector<16x1xf32>
    %69 = vector.broadcast %68 : vector<16x1xf32> to vector<16x128xf32>
    %c0_31 = arith.constant 0 : index
    %c0_32 = arith.constant 0 : index
    %70 = vector.load %arg4[%c0_31, %c0_32] : memref<16x128xf32, #tpu.memory_space<vmem>>, vector<16x128xf32>
    tpu.vector_store %arg4[%c0_31, %c0_32], %69 {strides = array<i32>} : memref<16x128xf32, #tpu.memory_space<vmem>>, vector<16x128xf32>,
    return
  }
}

</mosaic_0001>

<bundles_post_ra>
// kernel: forward.1
= control target key start
LH: loop header
LB: loop body
LE: loop exit
PB: predicated region body
PF: predicated region fallthrough
CT: control target
= control target key end

     0   :  { %9 = vsyncpa [#allocation3], 0  ;;  %s1350_s18 = smov [#allocation2]   ;;  %s1351_s20 = smov 128   ;;  %s1680_s0 = inlined_call_operand.vmem [shape: bf16[128,8], index: 0, kind: input, shape index: {}]   ;;  %s1681_s1 = inlined_call_operand.vmem [shape: bf16[128,128], index: 1, kind: input, shape index: {}]   ;;  %s1682_s2 = inlined_call_operand.vmem [shape: bf16[16,16], index: 2, kind: input, shape index: {}]   ;;  %s1683_s3 = inlined_call_operand.hbm [shape: f32[280,32], index: 3, kind: input, shape index: {}]   ;;  %s1684_s4 = inlined_call_operand.vmem [shape: f32[16,128], index: 4, kind: output, shape index: {}]  }
   0x1   :  { %s20_s17 = sshll.u32 %s1683_s3, 4  ;;  %s22_s19 = sshll.u32 %s1350_s18, 4  ;;  %s21_s17 = int_to_ptr.hbm [resolvable:$true] %s20_s17  ;;  %s23_s19 = int_to_ptr.vmem [resolvable:$true] %s22_s19 }
   0x2   :  { %s1352_s21 = smov 8  }
   0x3   :  { %28 = dma.hbm_to_vmem [thread:$0]  %s21_s17, 4480, %s23_s19, [#allocation3], %s1351_s20, %s1351_s20, %s1352_s21  }
   0x4   :  { %1348 = dma.done.wait [#allocation3], 4480  }
   0x5   :  { %1349 = vsyncadd [#allocation3], 4294962816  ;;  %v1209_v0 = vld [vmem:[%s1680_s0 + $0x38] sm:$0xff]  ;;  %v1208_v1 = vld [vmem:[%s1680_s0 + $0x30] sm:$0xff]  ;;  %vm291_vm0 = vcmask 64512   ;;  %vm321_vm1 = vcmask 130048  }
   0x6   :  { %178 = vmatpush.bf16.msra.mxu0 %v1209_v0  ;;  %v50_v2 = vld [vmem:[%s1680_s0] sm:$0xff]   ;;  %v1207_v5 = vld [vmem:[%s1680_s0 + $0x28] sm:$0xff]  ;;  %v1205_v8 = vld [vmem:[%s1680_s0 + $0x18] sm:$0xff]  ;;  %vm532_vm2 = vcmask 261120   ;;  %vm571_vm3 = vcmask 523264   ;;  %vm851_vm5 = vcmask 1041409  }
   0x7   :  { %v66_v3 = vunpack.c.l.bf16 %v50_v2  ;;  %v67_v4 = vunpack.c.h.bf16 %v50_v2  ;;  %v1206_v7 = vld [vmem:[%s1680_s0 + $0x20] sm:$0xff]  ;;  %v52_v9 = vld [vmem:[%s1680_s0 + $0x8] sm:$0xff]   ;;  %v1204_v10 = vld [vmem:[%s1680_s0 + $0x10] sm:$0xff]  ;;  %vm853_vm6 = vcmask 1042434   ;;  %vm855_vm7 = vcmask 1043459  }
   0x8   :  { %v68_v11 = vunpack.c.l.bf16 %v52_v9  ;;  %v69_v12 = vunpack.c.h.bf16 %v52_v9  ;;  %v1203_v14 = vld [vmem:[%s1680_s0 + $0x8] sm:$0xff]  ;;  %v1202_v15 = vld [vmem:[%s1680_s0] sm:$0xff]  ;;  %v54_v17 = vld [vmem:[%s1680_s0 + $0x10] sm:$0xff]   ;;  %vm857_vm8 = vcmask 1044484   ;;  %vm859_vm9 = vcmask 1045509  }
   0x9   :  { %v1217_v6 = vpack.i.bf16 %v67_v4, %v66_v3  ;;  %v1420_v16 = vld [vmem:[%s1681_s1] sm:$0xff]  ;;  %v70_v18 = vunpack.c.l.bf16 %v54_v17  ;;  %v71_v19 = vunpack.c.h.bf16 %v54_v17  ;;  %v1430_v21 = vld [vmem:[%s1681_s1 + $0x8] sm:$0xff]  ;;  %v56_v22 = vld [vmem:[%s1680_s0 + $0x18] sm:$0xff]   ;;  %vm861_vm10 = vcmask 1046534  }
   0xa   :  { %179 = vmatpush.bf16.msra.mxu0 %v1208_v1  ;;  %v1222_v13 = vpack.i.bf16 %v69_v12, %v68_v11  ;;  %v72_v23 = vunpack.c.l.bf16 %v56_v22  ;;  %v73_v24 = vunpack.c.h.bf16 %v56_v22  ;;  %v1440_v26 = vld [vmem:[%s1681_s1 + $0x10] sm:$0xff]  ;;  %v1446_v27 = vld [vmem:[%s1681_s1 + $0x18] sm:$0xff]  ;;  %v1452_v28 = vld [vmem:[%s1681_s1 + $0x20] sm:$0xff]  ;;  %vm863_vm11 = vcmask 1047559  }
   0xb   :  { %1218 = vrot.lane.b32.xlu0 %v1217_v6, %s1352_s21  ;;  %v1227_v20 = vpack.i.bf16 %v71_v19, %v70_v18  ;;  %v58_v29 = vld [vmem:[%s1680_s0 + $0x20] sm:$0xff]   ;;  %v62_v33 = vld [vmem:[%s1680_s0 + $0x30] sm:$0xff]   ;;  %v1466_v37 = vld [vmem:[%s1681_s1 + $0x28] sm:$0xff] }
   0xc   :  { %v1232_v25 = vpack.i.bf16 %v73_v24, %v72_v23  ;;  %v74_v30 = vunpack.c.l.bf16 %v58_v29  ;;  %v75_v31 = vunpack.c.h.bf16 %v58_v29  ;;  %v78_v34 = vunpack.c.l.bf16 %v62_v33  ;;  %v60_v38 = vld [vmem:[%s1680_s0 + $0x28] sm:$0xff]   ;;  %v64_v42 = vld [vmem:[%s1680_s0 + $0x38] sm:$0xff]   ;;  %v1480_v46 = vld [vmem:[%s1681_s1 + $0x30] sm:$0xff] }
   0xd   :  { %1228 = vrot.lane.b32.xlu1 %v1227_v20, %s1352_s21  ;;  %v79_v35 = vunpack.c.h.bf16 %v62_v33  ;;  %v76_v39 = vunpack.c.l.bf16 %v60_v38  ;;  %v77_v40 = vunpack.c.h.bf16 %v60_v38  ;;  %v80_v43 = vunpack.c.l.bf16 %v64_v42  ;;  %v316_v47 = vld [vmem:[#allocation2] sm:$0xff]  ;;  %v317_v48 = vld [vmem:[#allocation2 + $0x8] sm:$0xff]  ;;  %v1486_v50 = vld [vmem:[%s1681_s1 + $0x38] sm:$0xff]  ;;  %s1353_s1 = smov 32  }
   0xe   :  { %180 = vmatpush.bf16.msra.mxu0 %v1207_v5  ;;  %v1237_v32 = vpack.i.bf16 %v75_v31, %v74_v30  ;;  %v81_v44 = vunpack.c.h.bf16 %v64_v42  ;;  %v318_v49 = vpack.c.bf16 %v317_v48, %v316_v47 }
   0xf   :  { %v1247_v36 = vpack.i.bf16 %v79_v35, %v78_v34  ;;  %v1242_v41 = vpack.i.bf16 %v77_v40, %v76_v39 }
  0x10   :  { %1238 = vrot.lane.b32.xlu2 %v1237_v32, %s1352_s21  ;;  %v1252_v45 = vpack.i.bf16 %v81_v44, %v80_v43  ;;  %353 = vmatpush.bf16.msra.mxu1 %v318_v49 }
  0x12   :  { %181 = vmatpush.bf16.msra.mxu0 %v1206_v7 }
  0x13   :  { %1223 = vrot.lane.b32.xlu0 %v1222_v13, %s1352_s21 }
  0x15   :  { %1233 = vrot.lane.b32.xlu1 %v1232_v25, %s1352_s21 }
  0x16   :  { %182 = vmatpush.bf16.msra.mxu0 %v1205_v8 }
  0x18   :  { %1243 = vrot.lane.b32.xlu2 %v1242_v41, %s1352_s21 }
  0x1a   :  { %183 = vmatpush.bf16.msra.mxu0 %v1204_v10 }
  0x1b   :  { %1248 = vrot.lane.b32.xlu0 %v1247_v36, %s1352_s21 }
  0x1d   :  { %1253 = vrot.lane.b32.xlu1 %v1252_v45, %s1352_s21 }
  0x1e   :  { %184 = vmatpush.bf16.msra.mxu0 %v1203_v14 }
  0x22   :  { %185 = vmatpush.bf16.msra.mxu0 %v1202_v15 }
  0x25   :  { %186 = vmatmul.bf16.vlgmr.msra.gmra.mxu0 %v1420_v16 }
  0x35   :  { %191 = vmatmul.bf16.gmra.mxu0 %v1430_v21 }
  0x45   :  { %196 = vmatmul.bf16.gmra.mxu0 %v1440_v26 }
  0x55   :  { %201 = vmatmul.bf16.gmra.mxu0 %v1446_v27 }
  0x65   :  { %206 = vmatmul.bf16.gmra.mxu0 %v1452_v28 }
  0x6a   :  { %v1239_v22 = vpop.permute.xlu2 %1238 }
  0x6b   :  { %v1241_v23 = vunpack.i.h.bf16 %v1239_v22  ;;  %v1240_v24 = vunpack.i.l.bf16 %v1239_v22 }
  0x72   :  { %v1244_v33 = vpop.permute.xlu2 %1243 }
  0x73   :  { %v1246_v34 = vunpack.i.h.bf16 %v1244_v33  ;;  %v1245_v35 = vunpack.i.l.bf16 %v1244_v33 }
  0x75   :  { %211 = vmatmul.bf16.gmra.mxu0 %v1466_v37 }
  0x7d   :  { %v1219_v52 = vpop.permute.xlu0 %1218 }
  0x7e   :  { %v1221_v53 = vunpack.i.h.bf16 %v1219_v52  ;;  %v1220_v54 = vunpack.i.l.bf16 %v1219_v52 }
  0x7f   :  { %v1229_v4 = vpop.permute.xlu1 %1228 }
  0x80   :  { %v1231_v5 = vunpack.i.h.bf16 %v1229_v4  ;;  %v1230_v6 = vunpack.i.l.bf16 %v1229_v4 }
  0x85   :  { %216 = vmatmul.bf16.gmra.mxu0 %v1480_v46  ;;  %v1224_v60 = vpop.permute.xlu0 %1223 }
  0x86   :  { %v1226_v61 = vunpack.i.h.bf16 %v1224_v60  ;;  %v1225_v62 = vunpack.i.l.bf16 %v1224_v60  ;;  %v1513_v60 = vld [vmem:[#allocation2 + $0x10] ss:$0 sm:$0xff] }
  0x87   :  { %v1234_v12 = vpop.permute.xlu1 %1233 }
  0x88   :  { %v1236_v13 = vunpack.i.h.bf16 %v1234_v12  ;;  %v1235_v14 = vunpack.i.l.bf16 %v1234_v12 }
  0x8d   :  { %v1249_v42 = vpop.permute.xlu0 %1248 }
  0x8e   :  { %v1251_v43 = vunpack.i.h.bf16 %v1249_v42  ;;  %v1250_v44 = vunpack.i.l.bf16 %v1249_v42 }
  0x8f   :  { %v1254_v52 = vpop.permute.xlu1 %1253 }
  0x95   :  { %221 = vmatmul.bf16.gmra.mxu0 %v1486_v50 }
  0xa2   :  { %v187_v51 = vpop.f32.mrf.mxu0 }
  0xa3   :  { %v292_v56 = vsel %vm291_vm0, %v187_v51, %v1220_v54  ;;  %v1255_v54 = vunpack.i.l.bf16 %v1254_v52 }
  0xaa   :  { %v189_v55 = vpop.f32.mrf.mxu0 }
  0xab   :  { %v293_v57 = vsel %vm291_vm0, %v189_v55, %v1221_v53  ;;  %v1256_v53 = vunpack.i.h.bf16 %v1254_v52 }
  0xac   :  { %v308_v58 = vpack.c.bf16 %v293_v57, %v292_v56 }
  0xae   :  { %1167 = vmatmul.msk.bf16.vlgmr.msra.gmra.mxu1 %vm321_vm1, %v308_v58 }
  0xb2   :  { %v192_v59 = vpop.f32.mrf.mxu0 }
  0xb3   :  { %v294_v0 = vsel %vm291_vm0, %v192_v59, %v1225_v62 }
  0xba   :  { %v194_v63 = vpop.f32.mrf.mxu0 }
  0xbb   :  { %v295_v1 = vsel %vm291_vm0, %v194_v63, %v1226_v61 }
  0xbc   :  { %v309_v2 = vpack.c.bf16 %v295_v1, %v294_v0 }
  0xbe   :  { %1168 = vmatmul.msk.bf16.gmra.mxu1 %vm321_vm1, %v309_v2 }
  0xc2   :  { %v197_v3 = vpop.f32.mrf.mxu0 }
  0xc3   :  { %v296_v8 = vsel %vm291_vm0, %v197_v3, %v1230_v6 }
  0xca   :  { %v199_v7 = vpop.f32.mrf.mxu0 }
  0xcb   :  { %v297_v9 = vsel %vm291_vm0, %v199_v7, %v1231_v5 }
  0xcc   :  { %v310_v10 = vpack.c.bf16 %v297_v9, %v296_v8 }
  0xce   :  { %1169 = vmatmul.msk.bf16.gmra.mxu1 %vm321_vm1, %v310_v10 }
  0xd2   :  { %v202_v11 = vpop.f32.mrf.mxu0 }
  0xd3   :  { %v298_v17 = vsel %vm291_vm0, %v202_v11, %v1235_v14 }
  0xda   :  { %v204_v15 = vpop.f32.mrf.mxu0 }
  0xdb   :  { %v299_v18 = vsel %vm291_vm0, %v204_v15, %v1236_v13 }
  0xdc   :  { %v311_v19 = vpack.c.bf16 %v299_v18, %v298_v17 }
  0xde   :  { %1170 = vmatmul.msk.bf16.gmra.mxu1 %vm321_vm1, %v311_v19 }
  0xe2   :  { %v207_v20 = vpop.f32.mrf.mxu0 }
  0xe3   :  { %v300_v29 = vsel %vm291_vm0, %v207_v20, %v1240_v24 }
  0xea   :  { %v209_v25 = vpop.f32.mrf.mxu0 }
  0xeb   :  { %v301_v30 = vsel %vm291_vm0, %v209_v25, %v1241_v23 }
  0xec   :  { %v312_v31 = vpack.c.bf16 %v301_v30, %v300_v29 }
  0xee   :  { %1171 = vmatmul.msk.bf16.gmra.mxu1 %vm321_vm1, %v312_v31 }
  0xf2   :  { %v212_v32 = vpop.f32.mrf.mxu0 }
  0xf3   :  { %v302_v38 = vsel %vm291_vm0, %v212_v32, %v1245_v35 }
  0xfa   :  { %v214_v36 = vpop.f32.mrf.mxu0 }
  0xfb   :  { %v303_v39 = vsel %vm291_vm0, %v214_v36, %v1246_v34 }
  0xfc   :  { %v313_v40 = vpack.c.bf16 %v303_v39, %v302_v38 }
  0xfe   :  { %1172 = vmatmul.msk.bf16.gmra.mxu1 %vm321_vm1, %v313_v40 }
 0x102   :  { %v217_v41 = vpop.f32.mrf.mxu0 }
 0x103   :  { %v304_v47 = vsel %vm291_vm0, %v217_v41, %v1250_v44 }
 0x10a   :  { %v219_v45 = vpop.f32.mrf.mxu0 }
 0x10b   :  { %v305_v48 = vsel %vm291_vm0, %v219_v45, %v1251_v43 }
 0x10c   :  { %v314_v49 = vpack.c.bf16 %v305_v48, %v304_v47 }
 0x10e   :  { %1173 = vmatmul.msk.bf16.gmra.mxu1 %vm321_vm1, %v314_v49 }
 0x112   :  { %v222_v51 = vpop.f32.mrf.mxu0 }
 0x113   :  { %v306_v56 = vsel %vm291_vm0, %v222_v51, %v1255_v54 }
 0x11a   :  { %v224_v55 = vpop.f32.mrf.mxu0 }
 0x11b   :  { %v307_v57 = vsel %vm291_vm0, %v224_v55, %v1256_v53 }
 0x11c   :  { %v315_v58 = vpack.c.bf16 %v307_v57, %v306_v56 }
 0x11e   :  { %1174 = vmatmul.msk.bf16.gmra.mxu1 %vm321_vm1, %v315_v58 }
 0x12b   :  { %v355_v59 = vpop.f32.mrf.mxu1 }
 0x12c   :  { %v356_v61 = vadd.f32 %v1513_v60, %v355_v59 }
 0x12e   :  { %v395_v0 = vmax.f32 %v356_v61, 0.0 }
 0x133   :  { %v357_v62 = vpop.f32.mrf.mxu1 }
 0x134   :  { %v358_v63 = vadd.f32 %v1513_v60, %v357_v62 }
 0x136   :  { %v396_v1 = vmax.f32 %v358_v63, 0.0 }
 0x138   :  { %v1257_v2 = vpack.i.bf16 %v396_v1, %v395_v0  ;;  %v1517_v3 = vpack.c.bf16 %v396_v1, %v395_v0 }
 0x13a   :  { %1258 = vrot.lane.b32.xlu2 %v1257_v2, %s1353_s1 }
 0x13b   :  { %v360_v4 = vpop.f32.mrf.mxu1 }
 0x13c   :  { %v361_v5 = vadd.f32 %v1513_v60, %v360_v4 }
 0x13e   :  { %v397_v8 = vmax.f32 %v361_v5, 0.0 }
 0x143   :  { %v362_v6 = vpop.f32.mrf.mxu1 }
 0x144   :  { %v363_v7 = vadd.f32 %v1513_v60, %v362_v6  ;;  %v564_v6 = vld [vmem:[#allocation2 + $0x50] sm:$0xff] }
 0x146   :  { %v398_v9 = vmax.f32 %v363_v7, 0.0 }
 0x148   :  { %v1262_v10 = vpack.i.bf16 %v398_v9, %v397_v8  ;;  %v412_v11 = vpack.c.bf16 %v398_v9, %v397_v8  ;;  %v561_v8 = vld [vmem:[#allocation2 + $0x38] sm:$0xff] }
 0x14a   :  { %1263 = vrot.lane.b32.xlu0 %v1262_v10, %s1353_s1 }
 0x14b   :  { %v365_v12 = vpop.f32.mrf.mxu1 }
 0x14c   :  { %v366_v13 = vadd.f32 %v1513_v60, %v365_v12 }
 0x14e   :  { %v399_v17 = vmax.f32 %v366_v13, 0.0 }
 0x153   :  { %v367_v14 = vpop.f32.mrf.mxu1 }
 0x154   :  { %v368_v15 = vadd.f32 %v1513_v60, %v367_v14 }
 0x156   :  { %v400_v18 = vmax.f32 %v368_v15, 0.0 }
 0x158   :  { %v1267_v19 = vpack.i.bf16 %v400_v18, %v399_v17  ;;  %v413_v20 = vpack.c.bf16 %v400_v18, %v399_v17 }
 0x15a   :  { %1268 = vrot.lane.b32.xlu1 %v1267_v19, %s1353_s1 }
 0x15b   :  { %v370_v22 = vpop.f32.mrf.mxu1 }
 0x15c   :  { %v371_v23 = vadd.f32 %v1513_v60, %v370_v22 }
 0x15e   :  { %v401_v29 = vmax.f32 %v371_v23, 0.0 }
 0x163   :  { %v372_v24 = vpop.f32.mrf.mxu1 }
 0x164   :  { %v373_v25 = vadd.f32 %v1513_v60, %v372_v24 }
 0x166   :  { %v402_v30 = vmax.f32 %v373_v25, 0.0 }
 0x168   :  { %v1272_v31 = vpack.i.bf16 %v402_v30, %v401_v29  ;;  %v414_v32 = vpack.c.bf16 %v402_v30, %v401_v29 }
 0x16a   :  { %1273 = vrot.lane.b32.xlu2 %v1272_v31, %s1353_s1 }
 0x16b   :  { %v375_v33 = vpop.f32.mrf.mxu1 }
 0x16c   :  { %v376_v34 = vadd.f32 %v1513_v60, %v375_v33 }
 0x16e   :  { %v403_v38 = vmax.f32 %v376_v34, 0.0 }
 0x173   :  { %v377_v35 = vpop.f32.mrf.mxu1 }
 0x174   :  { %v378_v36 = vadd.f32 %v1513_v60, %v377_v35 }
 0x176   :  { %v404_v39 = vmax.f32 %v378_v36, 0.0 }
 0x178   :  { %v1277_v40 = vpack.i.bf16 %v404_v39, %v403_v38  ;;  %v415_v5 = vpack.c.bf16 %v404_v39, %v403_v38 }
 0x17a   :  { %1278 = vrot.lane.b32.xlu0 %v1277_v40, %s1353_s1 }
 0x17b   :  { %v380_v41 = vpop.f32.mrf.mxu1 }
 0x17c   :  { %v381_v42 = vadd.f32 %v1513_v60, %v380_v41 }
 0x17e   :  { %v405_v45 = vmax.f32 %v381_v42, 0.0 }
 0x183   :  { %v382_v43 = vpop.f32.mrf.mxu1 }
 0x184   :  { %v383_v44 = vadd.f32 %v1513_v60, %v382_v43 }
 0x186   :  { %v406_v47 = vmax.f32 %v383_v44, 0.0 }
 0x188   :  { %v1282_v48 = vpack.i.bf16 %v406_v47, %v405_v45  ;;  %v416_v4 = vpack.c.bf16 %v406_v47, %v405_v45 }
 0x18a   :  { %1283 = vrot.lane.b32.xlu1 %v1282_v48, %s1353_s1 }
 0x18b   :  { %v385_v49 = vpop.f32.mrf.mxu1 }
 0x18c   :  { %v386_v51 = vadd.f32 %v1513_v60, %v385_v49 }
 0x18e   :  { %v407_v54 = vmax.f32 %v386_v51, 0.0 }
 0x193   :  { %v387_v52 = vpop.f32.mrf.mxu1 }
 0x194   :  { %v388_v53 = vadd.f32 %v1513_v60, %v387_v52 }
 0x196   :  { %v408_v55 = vmax.f32 %v388_v53, 0.0 }
 0x198   :  { %v1287_v56 = vpack.i.bf16 %v408_v55, %v407_v54  ;;  %v417_v2 = vpack.c.bf16 %v408_v55, %v407_v54 }
 0x19a   :  { %1288 = vrot.lane.b32.xlu2 %v1287_v56, %s1353_s1 }
 0x19b   :  { %v390_v57 = vpop.f32.mrf.mxu1 }
 0x19c   :  { %v391_v58 = vadd.f32 %v1513_v60, %v390_v57 }
 0x19e   :  { %v409_v62 = vmax.f32 %v391_v58, 0.0 }
 0x1a3   :  { %v392_v59 = vpop.f32.mrf.mxu1 }
 0x1a4   :  { %v393_v61 = vadd.f32 %v1513_v60, %v392_v59  ;;  %v563_v60 = vld [vmem:[#allocation2 + $0x48] sm:$0xff] }
 0x1a5   :  { %v568_v7 = vpack.c.bf16 %v564_v6, %v563_v60 }
 0x1a6   :  { %v410_v63 = vmax.f32 %v393_v61, 0.0 }
 0x1a7   :  { %600 = vmatpush.bf16.msra.mxu3 %v568_v7 }
 0x1a8   :  { %v1292_v0 = vpack.i.bf16 %v410_v63, %v409_v62  ;;  %v418_v1 = vpack.c.bf16 %v410_v63, %v409_v62 }
 0x1aa   :  { %1293 = vrot.lane.b32.xlu0 %v1292_v0, %s1353_s1  ;;  %419 = vmatpush.bf16.msra.mxu2 %v418_v1 }
 0x1ae   :  { %420 = vmatpush.bf16.msra.mxu2 %v417_v2 }
 0x1b2   :  { %421 = vmatpush.bf16.msra.mxu2 %v416_v4 }
 0x1b6   :  { %422 = vmatpush.bf16.msra.mxu2 %v415_v5 }
 0x1ba   :  { %423 = vmatpush.bf16.msra.mxu2 %v414_v32 }
 0x1bc   :  { %v1264_v19 = vpop.permute.xlu0 %1263 }
 0x1bd   :  { %v1265_v22 = vunpack.i.l.bf16 %v1264_v19 }
 0x1be   :  { %424 = vmatpush.bf16.msra.mxu2 %v413_v20  ;;  %v1266_v20 = vunpack.i.h.bf16 %v1264_v19 }
 0x1c2   :  { %425 = vmatpush.bf16.msra.mxu2 %v412_v11 }
 0x1c6   :  { %426 = vmatpush.bf16.msra.mxu2 %v1517_v3  ;;  %v562_v3 = vld [vmem:[#allocation2 + $0x40] sm:$0xff] }
 0x1c7   :  { %v567_v9 = vpack.c.bf16 %v562_v3, %v561_v8 }
 0x1c9   :  { %427 = vmatmul.bf16.vlgmr.msra.gmra.mxu2 %v1420_v16  ;;  %601 = vmatpush.bf16.msra.mxu3 %v567_v9  ;;  %v559_v16 = vld [vmem:[#allocation2 + $0x28] sm:$0xff] }
 0x1cc   :  { %v1269_v30 = vpop.permute.xlu1 %1268 }
 0x1cd   :  { %v1271_v31 = vunpack.i.h.bf16 %v1269_v30  ;;  %v1270_v32 = vunpack.i.l.bf16 %v1269_v30 }
 0x1d9   :  { %432 = vmatmul.bf16.gmra.mxu2 %v1430_v21  ;;  %v560_v21 = vld [vmem:[#allocation2 + $0x30] sm:$0xff] }
 0x1da   :  { %v566_v10 = vpack.c.bf16 %v560_v21, %v559_v16 }
 0x1dc   :  { %602 = vmatpush.bf16.msra.mxu3 %v566_v10 }
 0x1e9   :  { %437 = vmatmul.bf16.gmra.mxu2 %v1440_v26  ;;  %v557_v26 = vld [vmem:[#allocation2 + $0x18] sm:$0xff] }
 0x1ec   :  { %v1279_v48 = vpop.permute.xlu0 %1278 }
 0x1ed   :  { %v1281_v49 = vunpack.i.h.bf16 %v1279_v48  ;;  %v1280_v51 = vunpack.i.l.bf16 %v1279_v48 }
 0x1f9   :  { %442 = vmatmul.bf16.gmra.mxu2 %v1446_v27  ;;  %v558_v27 = vld [vmem:[#allocation2 + $0x20] sm:$0xff] }
 0x1fa   :  { %v565_v11 = vpack.c.bf16 %v558_v27, %v557_v26 }
 0x1fc   :  { %603 = vmatpush.bf16.msra.mxu3 %v565_v11  ;;  %v1284_v57 = vpop.permute.xlu1 %1283 }
 0x1fd   :  { %v1286_v58 = vunpack.i.h.bf16 %v1284_v57  ;;  %v1285_v59 = vunpack.i.l.bf16 %v1284_v57 }
 0x209   :  { %447 = vmatmul.bf16.gmra.mxu2 %v1452_v28 }
 0x219   :  { %452 = vmatmul.bf16.gmra.mxu2 %v1466_v37  ;;  %v1259_v37 = vpop.permute.xlu2 %1258 }
 0x21a   :  { %v1261_v12 = vunpack.i.h.bf16 %v1259_v37  ;;  %v1260_v13 = vunpack.i.l.bf16 %v1259_v37  ;;  %v1574_v37 = vld [vmem:[#allocation2 + $0x58] ss:$0 sm:$0xff] }
 0x21c   :  { %v1294_v9 = vpop.permute.xlu0 %1293 }
 0x21d   :  { %v1296_v16 = vunpack.i.h.bf16 %v1294_v9  ;;  %v1295_v21 = vunpack.i.l.bf16 %v1294_v9 }
 0x221   :  { %v1274_v39 = vpop.permute.xlu2 %1273 }
 0x222   :  { %v1276_v40 = vunpack.i.h.bf16 %v1274_v39  ;;  %v1275_v41 = vunpack.i.l.bf16 %v1274_v39 }
 0x229   :  { %457 = vmatmul.bf16.gmra.mxu2 %v1480_v46  ;;  %v1289_v2 = vpop.permute.xlu2 %1288 }
 0x22a   :  { %v1291_v4 = vunpack.i.h.bf16 %v1289_v2  ;;  %v1290_v5 = vunpack.i.l.bf16 %v1289_v2 }
 0x239   :  { %462 = vmatmul.bf16.gmra.mxu2 %v1486_v50 }
 0x24c   :  { %v428_v28 = vpop.f32.mrf.mxu2 }
 0x24d   :  { %v533_v14 = vsel %vm532_vm2, %v428_v28, %v1260_v13  ;;  %v1354_v28 = vmov 8.0  }
 0x24e   :  { %1314 = vrcp.f32 %v1354_v28 }
 0x254   :  { %v430_v46 = vpop.f32.mrf.mxu2 }
 0x255   :  { %v534_v15 = vsel %vm532_vm2, %v430_v46, %v1261_v12  ;;  %v1315_v12 = vpop.eup %1314 }
 0x256   :  { %v549_v17 = vpack.c.bf16 %v534_v15, %v533_v14  ;;  %v774_v15 = vmul.f32 8.0, %v1315_v12  ;;  %vm778_vm4 = vweird.f32 %v1315_v12 }
 0x258   :  { %1175 = vmatmul.msk.bf16.vlgmr.msra.gmra.mxu3 %vm571_vm3, %v549_v17  ;;  %v775_v19 = vsub.f32 1.0, %v774_v15 }
 0x25c   :  { %v433_v18 = vpop.f32.mrf.mxu2 }
 0x25d   :  { %v535_v50 = vsel %vm532_vm2, %v433_v18, %v1265_v22 }
 0x264   :  { %v435_v23 = vpop.f32.mrf.mxu2 }
 0x265   :  { %v536_v24 = vsel %vm532_vm2, %v435_v23, %v1266_v20 }
 0x266   :  { %v550_v25 = vpack.c.bf16 %v536_v24, %v535_v50  ;;  %v776_v24 = vmul.f32 %v1315_v12, %v775_v19 }
 0x268   :  { %1176 = vmatmul.msk.bf16.gmra.mxu3 %vm571_vm3, %v550_v25 }
 0x26c   :  { %v438_v29 = vpop.f32.mrf.mxu2 }
 0x26d   :  { %v537_v34 = vsel %vm532_vm2, %v438_v29, %v1270_v32 }
 0x274   :  { %v440_v33 = vpop.f32.mrf.mxu2 }
 0x275   :  { %v538_v35 = vsel %vm532_vm2, %v440_v33, %v1271_v31  ;;  %v777_v33 = vadd.f32 %v1315_v12, %v776_v24 }
 0x276   :  { %v551_v36 = vpack.c.bf16 %v538_v35, %v537_v34 }
 0x278   :  { %1177 = vmatmul.msk.bf16.gmra.mxu3 %vm571_vm3, %v551_v36 }
 0x27c   :  { %v443_v38 = vpop.f32.mrf.mxu2 }
 0x27d   :  { %v539_v43 = vsel %vm532_vm2, %v443_v38, %v1275_v41 }
 0x284   :  { %v445_v42 = vpop.f32.mrf.mxu2 }
 0x285   :  { %v540_v44 = vsel %vm532_vm2, %v445_v42, %v1276_v40  ;;  %v1581_v40 = vsel %vm778_vm4, %v1315_v12, %v777_v33 }
 0x286   :  { %v552_v45 = vpack.c.bf16 %v540_v44, %v539_v43 }
 0x288   :  { %1178 = vmatmul.msk.bf16.gmra.mxu3 %vm571_vm3, %v552_v45 }
 0x28c   :  { %v448_v47 = vpop.f32.mrf.mxu2 }
 0x28d   :  { %v541_v53 = vsel %vm532_vm2, %v448_v47, %v1280_v51 }
 0x294   :  { %v450_v52 = vpop.f32.mrf.mxu2 }
 0x295   :  { %v542_v54 = vsel %vm532_vm2, %v450_v52, %v1281_v49 }
 0x296   :  { %v553_v55 = vpack.c.bf16 %v542_v54, %v541_v53 }
 0x298   :  { %1179 = vmatmul.msk.bf16.gmra.mxu3 %vm571_vm3, %v553_v55 }
 0x29c   :  { %v453_v56 = vpop.f32.mrf.mxu2 }
 0x29d   :  { %v543_v62 = vsel %vm532_vm2, %v453_v56, %v1285_v59 }
 0x2a4   :  { %v455_v61 = vpop.f32.mrf.mxu2 }
 0x2a5   :  { %v544_v63 = vsel %vm532_vm2, %v455_v61, %v1286_v58 }
 0x2a6   :  { %v554_v0 = vpack.c.bf16 %v544_v63, %v543_v62 }
 0x2a8   :  { %1180 = vmatmul.msk.bf16.gmra.mxu3 %vm571_vm3, %v554_v0 }
 0x2ac   :  { %v458_v1 = vpop.f32.mrf.mxu2 }
 0x2ad   :  { %v545_v6 = vsel %vm532_vm2, %v458_v1, %v1290_v5 }
 0x2b4   :  { %v460_v60 = vpop.f32.mrf.mxu2 }
 0x2b5   :  { %v546_v7 = vsel %vm532_vm2, %v460_v60, %v1291_v4 }
 0x2b6   :  { %v555_v8 = vpack.c.bf16 %v546_v7, %v545_v6 }
 0x2b8   :  { %1181 = vmatmul.msk.bf16.gmra.mxu3 %vm571_vm3, %v555_v8 }
 0x2bc   :  { %v463_v3 = vpop.f32.mrf.mxu2 }
 0x2bd   :  { %v547_v26 = vsel %vm532_vm2, %v463_v3, %v1295_v21 }
 0x2c4   :  { %v465_v10 = vpop.f32.mrf.mxu2 }
 0x2c5   :  { %v548_v27 = vsel %vm532_vm2, %v465_v10, %v1296_v16 }
 0x2c6   :  { %v556_v11 = vpack.c.bf16 %v548_v27, %v547_v26 }
 0x2c8   :  { %1182 = vmatmul.msk.bf16.gmra.mxu3 %vm571_vm3, %v556_v11 }
 0x2db   :  { %v605_v13 = vpop.f32.mrf.mxu3 }
 0x2dc   :  { %v606_v46 = vadd.f32 %v1574_v37, %v605_v13 }
 0x2de   :  { %v645_v14 = vmax.f32 %v606_v46, 0.0 }
 0x2e0   :  { %v661_v17 = vsel %vm532_vm2, %v645_v14, 0.0 }
 0x2e1   :  { %v662_v18 = vrot.slane %v661_v17, 4 }
 0x2e3   :  { %v663_v20 = vadd.f32 %v662_v18, %v661_v17  ;;  %v607_v22 = vpop.f32.mrf.mxu3 }
 0x2e4   :  { %v608_v23 = vadd.f32 %v1574_v37, %v607_v22 }
 0x2e5   :  { %v664_v50 = vrot.slane %v663_v20, 2 }
 0x2e6   :  { %v646_v25 = vmax.f32 %v608_v23, 0.0 }
 0x2e7   :  { %v665_v29 = vadd.f32 %v664_v50, %v663_v20 }
 0x2e8   :  { %v668_v30 = vsel %vm532_vm2, %v646_v25, 0.0 }
 0x2e9   :  { %v666_v31 = vrot.slane %v665_v29, 1  ;;  %v669_v32 = vrot.slane %v668_v30, 4 }
 0x2eb   :  { %v670_v34 = vadd.f32 %v669_v32, %v668_v30  ;;  %v610_v35 = vpop.f32.mrf.mxu3  ;;  %v667_v38 = vadd.f32 %v666_v31, %v665_v29 }
 0x2ec   :  { %v611_v36 = vadd.f32 %v1574_v37, %v610_v35 }
 0x2ed   :  { %v671_v39 = vrot.slane %v670_v34, 2  ;;  %v780_v44 = vmul.f32 %v1581_v40, %v667_v38 }
 0x2ee   :  { %v647_v41 = vmax.f32 %v611_v36, 0.0 }
 0x2ef   :  { %v672_v42 = vadd.f32 %v671_v39, %v670_v34  ;;  %v798_v53 = vpack.c.bf16 %v780_v44, %v780_v44 }
 0x2f0   :  { %v675_v43 = vsel %vm532_vm2, %v647_v41, 0.0 }
 0x2f1   :  { %v673_v45 = vrot.slane %v672_v42, 1  ;;  %v676_v47 = vrot.slane %v675_v43, 4  ;;  %v835_v62 = vunpack.c.l.b16 %v798_v53 }
 0x2f3   :  { %v674_v48 = vadd.f32 %v673_v45, %v672_v42  ;;  %v677_v49 = vadd.f32 %v676_v47, %v675_v43  ;;  %v612_v51 = vpop.f32.mrf.mxu3 }
 0x2f4   :  { %v613_v52 = vadd.f32 %v1574_v37, %v612_v51 }
 0x2f5   :  { %v781_v54 = vmul.f32 %v1581_v40, %v674_v48  ;;  %v678_v55 = vrot.slane %v677_v49, 2 }
 0x2f6   :  { %v648_v56 = vmax.f32 %v613_v52, 0.0 }
 0x2f7   :  { %v799_v57 = vpack.c.bf16 %v781_v54, %v781_v54  ;;  %v907_v58 = vsel %vm851_vm5, %v781_v54, %v780_v44  ;;  %v679_v59 = vadd.f32 %v678_v55, %v677_v49 }
 0x2f8   :  { %v682_v61 = vsel %vm532_vm2, %v648_v56, 0.0 }
 0x2f9   :  { %v836_v63 = vunpack.c.l.b16 %v799_v57  ;;  %v680_v0 = vrot.slane %v679_v59, 1  ;;  %v683_v1 = vrot.slane %v682_v61, 4 }
 0x2fb   :  { %v681_v2 = vadd.f32 %v680_v0, %v679_v59  ;;  %v684_v4 = vadd.f32 %v683_v1, %v682_v61  ;;  %v615_v5 = vpop.f32.mrf.mxu3  ;;  %v852_v60 = vsel %vm851_vm5, %v836_v63, %v835_v62 }
 0x2fc   :  { %v616_v6 = vadd.f32 %v1574_v37, %v615_v5 }
 0x2fd   :  { %v782_v7 = vmul.f32 %v1581_v40, %v681_v2  ;;  %v685_v8 = vrot.slane %v684_v4, 2 }
 0x2fe   :  { %v649_v3 = vmax.f32 %v616_v6, 0.0 }
 0x2ff   :  { %v800_v9 = vpack.c.bf16 %v782_v7, %v782_v7  ;;  %v908_v16 = vsel %vm853_vm6, %v782_v7, %v907_v58  ;;  %v686_v21 = vadd.f32 %v685_v8, %v684_v4 }
 0x300   :  { %v689_v10 = vsel %vm532_vm2, %v649_v3, 0.0 }
 0x301   :  { %v837_v26 = vunpack.c.l.b16 %v800_v9  ;;  %v687_v27 = vrot.slane %v686_v21, 1  ;;  %v690_v11 = vrot.slane %v689_v10, 4 }
 0x303   :  { %v688_v28 = vadd.f32 %v687_v27, %v686_v21  ;;  %v691_v12 = vadd.f32 %v690_v11, %v689_v10  ;;  %v617_v13 = vpop.f32.mrf.mxu3  ;;  %v854_v46 = vsel %vm853_vm6, %v837_v26, %v852_v60 }
 0x304   :  { %v618_v14 = vadd.f32 %v1574_v37, %v617_v13 }
 0x305   :  { %v783_v15 = vmul.f32 %v1581_v40, %v688_v28  ;;  %v692_v17 = vrot.slane %v691_v12, 2 }
 0x306   :  { %v650_v18 = vmax.f32 %v618_v14, 0.0 }
 0x307   :  { %v801_v19 = vpack.c.bf16 %v783_v15, %v783_v15  ;;  %v693_v20 = vadd.f32 %v692_v17, %v691_v12  ;;  %v909_v22 = vsel %vm855_vm7, %v783_v15, %v908_v16 }
 0x308   :  { %v696_v23 = vsel %vm532_vm2, %v650_v18, 0.0 }
 0x309   :  { %v838_v50 = vunpack.c.l.b16 %v801_v19  ;;  %v694_v24 = vrot.slane %v693_v20, 1  ;;  %v697_v25 = vrot.slane %v696_v23, 4 }
 0x30b   :  { %v695_v29 = vadd.f32 %v694_v24, %v693_v20  ;;  %v698_v30 = vadd.f32 %v697_v25, %v696_v23  ;;  %v620_v31 = vpop.f32.mrf.mxu3  ;;  %v856_v32 = vsel %vm855_vm7, %v838_v50, %v854_v46 }
 0x30c   :  { %v621_v33 = vadd.f32 %v1574_v37, %v620_v31 }
 0x30d   :  { %v784_v34 = vmul.f32 %v1581_v40, %v695_v29  ;;  %v699_v35 = vrot.slane %v698_v30, 2 }
 0x30e   :  { %v651_v36 = vmax.f32 %v621_v33, 0.0 }
 0x30f   :  { %v802_v38 = vpack.c.bf16 %v784_v34, %v784_v34  ;;  %v700_v39 = vadd.f32 %v699_v35, %v698_v30  ;;  %v910_v41 = vsel %vm857_vm8, %v784_v34, %v909_v22 }
 0x310   :  { %v703_v42 = vsel %vm532_vm2, %v651_v36, 0.0 }
 0x311   :  { %v839_v43 = vunpack.c.l.b16 %v802_v38  ;;  %v701_v44 = vrot.slane %v700_v39, 1  ;;  %v704_v45 = vrot.slane %v703_v42, 4 }
 0x313   :  { %v702_v47 = vadd.f32 %v701_v44, %v700_v39  ;;  %v705_v48 = vadd.f32 %v704_v45, %v703_v42  ;;  %v622_v49 = vpop.f32.mrf.mxu3  ;;  %v858_v51 = vsel %vm857_vm8, %v839_v43, %v856_v32 }
 0x314   :  { %v623_v52 = vadd.f32 %v1574_v37, %v622_v49 }
 0x315   :  { %v785_v53 = vmul.f32 %v1581_v40, %v702_v47  ;;  %v706_v54 = vrot.slane %v705_v48, 2 }
 0x316   :  { %v652_v55 = vmax.f32 %v623_v52, 0.0 }
 0x317   :  { %v707_v56 = vadd.f32 %v706_v54, %v705_v48  ;;  %v911_v57 = vsel %vm859_vm9, %v785_v53, %v910_v41  ;;  %v803_v58 = vpack.c.bf16 %v785_v53, %v785_v53 }
 0x318   :  { %v710_v59 = vsel %vm532_vm2, %v652_v55, 0.0 }
 0x319   :  { %v708_v61 = vrot.slane %v707_v56, 1  ;;  %v711_v62 = vrot.slane %v710_v59, 4  ;;  %v840_v63 = vunpack.c.l.b16 %v803_v58 }
 0x31b   :  { %v709_v0 = vadd.f32 %v708_v61, %v707_v56  ;;  %v712_v1 = vadd.f32 %v711_v62, %v710_v59  ;;  %v625_v2 = vpop.f32.mrf.mxu3  ;;  %v860_v4 = vsel %vm859_vm9, %v840_v63, %v858_v51 }
 0x31c   :  { %v626_v17 = vadd.f32 %v1574_v37, %v625_v2 }
 0x31d   :  { %v786_v5 = vmul.f32 %v1581_v40, %v709_v0  ;;  %v713_v60 = vrot.slane %v712_v1, 2 }
 0x31e   :  { %v653_v23 = vmax.f32 %v626_v17, 0.0 }
 0x31f   :  { %v714_v6 = vadd.f32 %v713_v60, %v712_v1  ;;  %v912_v7 = vsel %vm861_vm10, %v786_v5, %v911_v57  ;;  %v804_v8 = vpack.c.bf16 %v786_v5, %v786_v5 }
 0x320   :  { %v717_v31 = vsel %vm532_vm2, %v653_v23, 0.0 }
 0x321   :  { %v715_v3 = vrot.slane %v714_v6, 1  ;;  %v841_v9 = vunpack.c.l.b16 %v804_v8  ;;  %v718_v36 = vrot.slane %v717_v31, 4 }
 0x323   :  { %v716_v16 = vadd.f32 %v715_v3, %v714_v6  ;;  %v627_v21 = vpop.f32.mrf.mxu3  ;;  %v862_v10 = vsel %vm861_vm10, %v841_v9, %v860_v4  ;;  %v719_v47 = vadd.f32 %v718_v36, %v717_v31 }
 0x324   :  { %v628_v14 = vadd.f32 %v1574_v37, %v627_v21 }
 0x325   :  { %v787_v26 = vmul.f32 %v1581_v40, %v716_v16  ;;  %v720_v55 = vrot.slane %v719_v47, 2 }
 0x326   :  { %v654_v19 = vmax.f32 %v628_v14, 0.0 }
 0x327   :  { %v1615_v27 = vsel %vm863_vm11, %v787_v26, %v912_v7  ;;  %v805_v11 = vpack.c.bf16 %v787_v26, %v787_v26  ;;  %v721_v2 = vadd.f32 %v720_v55, %v719_v47 }
 0x328   :  { %v724_v25 = vsel %vm532_vm2, %v654_v19, 0.0 }
 0x329   :  { %v842_v28 = vunpack.c.l.b16 %v805_v11  ;;  %v725_v33 = vrot.slane %v724_v25, 4  ;;  %v722_v9 = vrot.slane %v721_v2, 1 }
 0x32b   :  { %v630_v12 = vpop.f32.mrf.mxu3  ;;  %v1618_v13 = vsel %vm863_vm11, %v842_v28, %v862_v10  ;;  %v726_v43 = vadd.f32 %v725_v33, %v724_v25  ;;  %v723_v17 = vadd.f32 %v722_v9, %v721_v2 }
 0x32c   :  { %v631_v15 = vadd.f32 %v1574_v37, %v630_v12 }
 0x32d   :  { %v727_v52 = vrot.slane %v726_v43, 2 }
 0x32e   :  { %v655_v20 = vmax.f32 %v631_v15, 0.0 }
 0x32f   :  { %v728_v62 = vadd.f32 %v727_v52, %v726_v43 }
 0x330   :  { %v731_v30 = vsel %vm532_vm2, %v655_v20, 0.0 }
 0x331   :  { %v732_v35 = vrot.slane %v731_v30, 4  ;;  %v729_v6 = vrot.slane %v728_v62, 1 }
 0x333   :  { %v632_v46 = vpop.f32.mrf.mxu3  ;;  %v733_v44 = vadd.f32 %v732_v35, %v731_v30  ;;  %v730_v28 = vadd.f32 %v729_v6, %v728_v62 }
 0x334   :  { %v633_v18 = vadd.f32 %v1574_v37, %v632_v46 }
 0x335   :  { %v734_v54 = vrot.slane %v733_v44, 2  ;;  %v789_v23 = vmul.f32 %v1581_v40, %v730_v28  ;;  %v934_v28 = vld [vmem:[#allocation2 + $0x80] sm:$0xff] }
 0x336   :  { %v656_v50 = vmax.f32 %v633_v18, 0.0 }
 0x337   :  { %v735_v0 = vadd.f32 %v734_v54, %v733_v44 }
 0x338   :  { %v738_v32 = vsel %vm532_vm2, %v656_v50, 0.0 }
 0x339   :  { %v739_v38 = vrot.slane %v738_v32, 4  ;;  %v736_v3 = vrot.slane %v735_v0, 1 }
 0x33b   :  { %v635_v22 = vpop.f32.mrf.mxu3  ;;  %v740_v48 = vadd.f32 %v739_v38, %v738_v32  ;;  %v737_v14 = vadd.f32 %v736_v3, %v735_v0 }
 0x33c   :  { %v636_v24 = vadd.f32 %v1574_v37, %v635_v22 }
 0x33d   :  { %v741_v56 = vrot.slane %v740_v48, 2 }
 0x33e   :  { %v657_v29 = vmax.f32 %v636_v24, 0.0 }
 0x33f   :  { %v742_v4 = vadd.f32 %v741_v56, %v740_v48 }
 0x340   :  { %v745_v34 = vsel %vm532_vm2, %v657_v29, 0.0  ;;  %v790_v29 = vmul.f32 %v1581_v40, %v737_v14  ;;  %v932_v14 = vld [vmem:[#allocation2 + $0x70] sm:$0xff] }
 0x341   :  { %v746_v41 = vrot.slane %v745_v34, 4  ;;  %v743_v16 = vrot.slane %v742_v4, 1 }
 0x342   :  { %v808_v38 = vpack.c.bf16 %v790_v29, %v790_v29 }
 0x343   :  { %v637_v39 = vpop.f32.mrf.mxu3  ;;  %v747_v49 = vadd.f32 %v746_v41, %v745_v34  ;;  %v744_v18 = vadd.f32 %v743_v16, %v742_v4  ;;  %v807_v34 = vpack.c.bf16 %v789_v23, %v789_v23 }
 0x344   :  { %v638_v42 = vadd.f32 %v1574_v37, %v637_v39 }
 0x345   :  { %v748_v59 = vrot.slane %v747_v49, 2  ;;  %v791_v30 = vmul.f32 %v1581_v40, %v744_v18  ;;  %v931_v18 = vld [vmem:[#allocation2 + $0x68] sm:$0xff] }
 0x346   :  { %v658_v45 = vmax.f32 %v638_v42, 0.0 }
 0x347   :  { %v749_v5 = vadd.f32 %v748_v59, %v747_v49  ;;  %v809_v42 = vpack.c.bf16 %v791_v30, %v791_v30 }
 0x348   :  { %v752_v51 = vsel %vm532_vm2, %v658_v45, 0.0  ;;  %v844_v45 = vunpack.c.l.b16 %v807_v34 }
 0x349   :  { %v753_v53 = vrot.slane %v752_v51, 4  ;;  %v750_v26 = vrot.slane %v749_v5, 1  ;;  %v846_v55 = vunpack.c.l.b16 %v809_v42  ;;  %v996_v42 = vld [vmem:[#allocation2 + $0xe0] sm:$0xff] }
 0x34b   :  { %v754_v57 = vadd.f32 %v753_v53, %v752_v51  ;;  %v640_v58 = vpop.f32.mrf.mxu3  ;;  %v751_v20 = vadd.f32 %v750_v26, %v749_v5  ;;  %v845_v51 = vunpack.c.l.b16 %v808_v38  ;;  %v937_v26 = vld [vmem:[#allocation2 + $0x98] sm:$0xff] }
 0x34c   :  { %v641_v61 = vadd.f32 %v1574_v37, %v640_v58 }
 0x34d   :  { %v755_v63 = vrot.slane %v754_v57, 2  ;;  %v792_v33 = vmul.f32 %v1581_v40, %v751_v20 }
 0x34e   :  { %v659_v1 = vmax.f32 %v641_v61, 0.0 }
 0x34f   :  { %v756_v7 = vadd.f32 %v755_v63, %v754_v57  ;;  %v810_v44 = vpack.c.bf16 %v792_v33, %v792_v33 }
 0x350   :  { %v759_v60 = vsel %vm532_vm2, %v659_v1, 0.0 }
 0x351   :  { %v760_v8 = vrot.slane %v759_v60, 4  ;;  %v757_v12 = vrot.slane %v756_v7, 1  ;;  %v847_v58 = vunpack.c.l.b16 %v810_v44  ;;  %v993_v44 = vld [vmem:[#allocation2 + $0xc8] sm:$0xff] }
 0x353   :  { %v761_v21 = vadd.f32 %v760_v8, %v759_v60  ;;  %v642_v10 = vpop.f32.mrf.mxu3  ;;  %v758_v50 = vadd.f32 %v757_v12, %v756_v7  ;;  %v935_v12 = vld [vmem:[#allocation2 + $0x88] sm:$0xff] }
 0x354   :  { %v643_v11 = vadd.f32 %v1574_v37, %v642_v10  ;;  %v788_v37 = vmul.f32 %v1581_v40, %v723_v17  ;;  %v1210_v10 = vld [vmem:[%s1682_s2] sm:$0xff] }
 0x355   :  { %v762_v46 = vrot.slane %v761_v21, 2  ;;  %v793_v35 = vmul.f32 %v1581_v40, %v758_v50 }
 0x356   :  { %v660_v15 = vmax.f32 %v643_v11, 0.0  ;;  %v806_v41 = vpack.c.bf16 %v788_v37, %v788_v37  ;;  %v914_v47 = vsel %vm851_vm5, %v789_v23, %v788_v37 }
 0x357   :  { %v763_v19 = vadd.f32 %v762_v46, %v761_v21  ;;  %v811_v49 = vpack.c.bf16 %v793_v35, %v793_v35  ;;  %v915_v52 = vsel %vm853_vm6, %v790_v29, %v914_v47  ;;  %v940_v46 = vpack.c.bf16 %v935_v12, %v934_v28 }
 0x358   :  { %v766_v22 = vsel %vm532_vm2, %v660_v15, 0.0  ;;  %v843_v54 = vunpack.c.l.b16 %v806_v41  ;;  %v916_v57 = vsel %vm855_vm7, %v791_v30, %v915_v52  ;;  %v933_v15 = vld [vmem:[#allocation2 + $0x78] sm:$0xff]  ;;  %v989_v52 = vld [vmem:[#allocation2 + $0xa8] sm:$0xff] }
 0x359   :  { %v764_v24 = vrot.slane %v763_v19, 1  ;;  %v767_v25 = vrot.slane %v766_v22, 4  ;;  %v917_v59 = vsel %vm857_vm8, %v792_v33, %v916_v57  ;;  %v848_v63 = vunpack.c.l.b16 %v811_v49  ;;  %v995_v41 = vld [vmem:[#allocation2 + $0xd8] sm:$0xff]  ;;  %v992_v49 = vld [vmem:[#allocation2 + $0xc0] sm:$0xff] }
 0x35a   :  { %v918_v62 = vsel %vm859_vm9, %v793_v35, %v917_v59  ;;  %v865_v0 = vsel %vm851_vm5, %v844_v45, %v843_v54  ;;  %v939_v17 = vpack.c.bf16 %v933_v15, %v932_v14  ;;  %v994_v45 = vld [vmem:[#allocation2 + $0xd0] sm:$0xff] }
 0x35b   :  { %v765_v31 = vadd.f32 %v764_v24, %v763_v19  ;;  %v768_v32 = vadd.f32 %v767_v25, %v766_v22  ;;  %v866_v4 = vsel %vm853_vm6, %v845_v51, %v865_v0  ;;  %v999_v47 = vpack.c.bf16 %v994_v45, %v993_v44  ;;  %v1024_v0 = vld [vmem:[#allocation2 + $0x100] sm:$0xff] }
 0x35c   :  { %v867_v6 = vsel %vm855_vm7, %v846_v55, %v866_v4  ;;  %v1022_v4 = vld [vmem:[#allocation2 + $0xf0] sm:$0xff] }
 0x35d   :  { %v769_v36 = vrot.slane %v768_v32, 2  ;;  %v794_v39 = vmul.f32 %v1581_v40, %v765_v31  ;;  %v868_v8 = vsel %vm857_vm8, %v847_v58, %v867_v6  ;;  %v1311_v31 = vld [vmem:[#allocation2 + $0xa0] ss:$0 sm:$0xff] }
 0x35e   :  { %v869_v3 = vsel %vm859_vm9, %v848_v63, %v868_v8 }
 0x35f   :  { %v770_v43 = vadd.f32 %v769_v36, %v768_v32  ;;  %v812_v53 = vpack.c.bf16 %v794_v39, %v794_v39  ;;  %v919_v1 = vsel %vm861_vm10, %v794_v39, %v918_v62 }
 0x361   :  { %v771_v48 = vrot.slane %v770_v43, 1  ;;  %v849_v2 = vunpack.c.l.b16 %v812_v53  ;;  %v990_v53 = vld [vmem:[#allocation2 + $0xb0] sm:$0xff] }
 0x362   :  { %v997_v54 = vpack.c.bf16 %v990_v53, %v989_v52 }
 0x363   :  { %v772_v56 = vadd.f32 %v771_v48, %v770_v43  ;;  %v870_v9 = vsel %vm861_vm10, %v849_v2, %v869_v3  ;;  %v1000_v43 = vpack.c.bf16 %v996_v42, %v995_v41  ;;  %v991_v48 = vld [vmem:[#allocation2 + $0xb8] sm:$0xff] }
 0x364   :  { %v998_v51 = vpack.c.bf16 %v992_v49, %v991_v48 }
 0x365   :  { %v795_v61 = vmul.f32 %v1581_v40, %v772_v56  ;;  %1010 = vmatpush.bf16.msrb.mxu0 %v1000_v43 }
 0x367   :  { %v920_v5 = vsel %vm863_vm11, %v795_v61, %v919_v1  ;;  %v813_v60 = vpack.c.bf16 %v795_v61, %v795_v61  ;;  %v1025_v1 = vld [vmem:[#allocation2 + $0x108] sm:$0xff] }
 0x368   :  { %v1297_v7 = vpack.i.bf16 %v920_v5, %v1615_v27  ;;  %v936_v27 = vld [vmem:[#allocation2 + $0x90] sm:$0xff]  ;;  %v1027_v2 = vpack.c.bf16 %v1025_v1, %v1024_v0  ;;  %v1023_v5 = vld [vmem:[#allocation2 + $0xf8] sm:$0xff] }
 0x369   :  { %v850_v40 = vunpack.c.l.b16 %v813_v60  ;;  %v941_v11 = vpack.c.bf16 %v937_v26, %v936_v27  ;;  %1011 = vmatpush.bf16.msrb.mxu0 %v999_v47  ;;  %v1026_v60 = vpack.c.bf16 %v1023_v5, %v1022_v4  ;;  %v1313_v27 = vld [vmem:[#allocation2 + $0x110] ss:$0 sm:$0xff] }
 0x36a   :  { %1298 = vrot.lane.b32.xlu1 %v1297_v7, %s1353_s1  ;;  %1040 = vmatpush.bf16.msrb.mxu2 %v1027_v2  ;;  %v1312_v7 = vld [vmem:[#allocation2 + $0xe8] ss:$0 sm:$0xff] }
 0x36b   :  { %v871_v16 = vsel %vm863_vm11, %v850_v40, %v870_v9  ;;  %951 = vmatpush.bf16.msrb.mxu3 %v941_v11 }
 0x36c   :  { %v872_v21 = vpack.c.b16 %v871_v16, %v1618_v13  ;;  %v930_v13 = vld [vmem:[#allocation2 + $0x60] sm:$0xff] }
 0x36d   :  { %v938_v19 = vpack.c.bf16 %v931_v18, %v930_v13  ;;  %1012 = vmatpush.bf16.msrb.mxu0 %v998_v51 }
 0x36e   :  { %884 = vmatpush.bf16.msrb.mxu1 %v872_v21  ;;  %1041 = vmatpush.bf16.msrb.mxu2 %v1026_v60 }
 0x36f   :  { %952 = vmatpush.bf16.msrb.mxu3 %v940_v46 }
 0x371   :  { %1187 = vmatmul.msk.bf16.vlgmr.msrb.gmra.mxu1 %vm321_vm1, %v1210_v10  ;;  %1013 = vmatpush.bf16.msrb.mxu0 %v997_v54 }
 0x373   :  { %953 = vmatpush.bf16.msrb.mxu3 %v939_v17 }
 0x377   :  { %954 = vmatpush.bf16.msrb.mxu3 %v938_v19 }
 0x3dc   :  { %v1299_v22 = vpop.permute.xlu1 %1298 }
 0x3dd   :  { %v1301_v23 = vunpack.i.h.bf16 %v1299_v22  ;;  %v1300_v50 = vunpack.i.l.bf16 %v1299_v22 }
 0x3ee   :  { %v886_v20 = vpop.f32.mrf.mxu1 }
 0x3ef   :  { %v927_v25 = vsel %vm532_vm2, %v886_v20, %v1300_v50 }
 0x3f6   :  { %v888_v24 = vpop.f32.mrf.mxu1 }
 0x3f7   :  { %v928_v29 = vsel %vm532_vm2, %v888_v24, %v1301_v23 }
 0x3f8   :  { %v929_v37 = vpack.c.bf16 %v928_v29, %v927_v25 }
 0x3fa   :  { %1188 = vmatmul.msk.bf16.vlgmr.msrb.gmra.mxu3 %vm571_vm3, %v929_v37 }
 0x47d   :  { %v956_v30 = vpop.f32.mrf.mxu3 }
 0x47e   :  { %v957_v32 = vadd.f32 %v1311_v31, %v956_v30 }
 0x480   :  { %v961_v35 = vmax.f32 %v957_v32, 0.0 }
 0x485   :  { %v958_v33 = vpop.f32.mrf.mxu3 }
 0x486   :  { %v959_v34 = vadd.f32 %v1311_v31, %v958_v33 }
 0x488   :  { %v962_v36 = vmax.f32 %v959_v34, 0.0 }
 0x48a   :  { %v1302_v38 = vpack.i.bf16 %v962_v36, %v961_v35  ;;  %v963_v39 = vpack.c.bf16 %v962_v36, %v961_v35 }
 0x48c   :  { %1303 = vrot.lane.b32.xlu2 %v1302_v38, %s1353_s1  ;;  %971 = vmatpush.bf16.msra.mxu1 %v963_v39 }
 0x48f   :  { %1189 = vmatmul.msk.bf16.vlgmr.msra.gmra.mxu1 %vm321_vm1, %v1210_v10  ;;  %v1355_v10 = vmov 0  }
 0x490   :  { %1307 = vset.pattern.permute.xlu0 %v1355_v10  ;;  %1308 = vset.pattern.permute.xlu1 %v1355_v10 }
 0x4e6   :  { %v1304_v56 = vpop.permute.xlu2 %1303 }
 0x4e7   :  { %v1306_v57 = vunpack.i.h.bf16 %v1304_v56  ;;  %v1305_v58 = vunpack.i.l.bf16 %v1304_v56 }
 0x50c   :  { %v973_v55 = vpop.f32.mrf.mxu1 }
 0x50d   :  { %v986_v61 = vsel %vm532_vm2, %v973_v55, %v1305_v58 }
 0x514   :  { %v975_v59 = vpop.f32.mrf.mxu1 }
 0x515   :  { %v987_v62 = vsel %vm532_vm2, %v975_v59, %v1306_v57 }
 0x516   :  { %v988_v63 = vpack.c.bf16 %v987_v62, %v986_v61 }
 0x518   :  { %1190 = vmatmul.msk.bf16.vlgmr.msrb.gmra.mxu0 %vm571_vm3, %v988_v63 }
 0x595   :  { %v1015_v6 = vpop.f32.mrf.mxu0 }
 0x596   :  { %v1016_v8 = vadd.f32 %v1312_v7, %v1015_v6 }
 0x598   :  { %v1020_v9 = vmax.f32 %v1016_v8, 0.0 }
 0x59d   :  { %v1017_v40 = vpop.f32.mrf.mxu0 }
 0x59e   :  { %v1018_v3 = vadd.f32 %v1312_v7, %v1017_v40 }
 0x5a0   :  { %v1021_v16 = vmax.f32 %v1018_v3, 0.0 }
 0x5a2   :  { %v1028_v21 = vpack.c.bf16 %v1021_v16, %v1020_v9 }
 0x5a4   :  { %1191 = vmatmul.msk.bf16.vlgmr.msrb.gmra.mxu2 %vm532_vm2, %v1028_v21 }
 0x627   :  { %v1043_v26 = vpop.f32.mrf.mxu2 }
 0x628   :  { %v1044_v11 = vadd.f32 %v1313_v27, %v1043_v26 }
 0x62a   :  { %v1192_v28 = vmul.f32 -1.442695, %v1044_v11 }
 0x62c   :  { %1316 = vpow2.f32 %v1192_v28 }
 0x62f   :  { %v1045_v12 = vpop.f32.mrf.mxu2 }
 0x630   :  { %v1046_v46 = vadd.f32 %v1313_v27, %v1045_v12 }
 0x632   :  { %v1317_v14 = vpop.eup %1316  ;;  %v1193_v15 = vmul.f32 -1.442695, %v1046_v46 }
 0x633   :  { %v1054_v17 = vadd.f32 1.0, %v1317_v14 }
 0x634   :  { %1318 = vpow2.f32 %v1193_v15 }
 0x635   :  { %1320 = vrcp.f32 %v1054_v17  ;;  %v1067_v23 = vand.u32 2147483648, %v1054_v17  ;;  %v1065_v24 = vand.u32 2147483647, %v1054_v17  ;;  %vm1061_vm13 = vweird.f32 %v1054_v17 }
 0x637   :  { %v1068_v37 = vor.u32 1.1754944e-38, %v1067_v23  ;;  %vm1066_vm15 = vcmp.eq.f32.partialorder %v1065_v24, 8.507059e+37 }
 0x63a   :  { %v1319_v13 = vpop.eup %1318 }
 0x63b   :  { %v1321_v18 = vpop.eup %1320  ;;  %v1055_v19 = vadd.f32 1.0, %v1319_v13 }
 0x63c   :  { %v1057_v20 = vmul.f32 %v1321_v18, %v1054_v17  ;;  %vm1062_vm12 = vweird.f32 %v1321_v18 }
 0x63d   :  { %1322 = vrcp.f32 %v1055_v19  ;;  %vm1063_vm14 = vmor %vm1061_vm13, %vm1062_vm12  ;;  %v1082_v34 = vand.u32 2147483648, %v1055_v19  ;;  %v1080_v36 = vand.u32 2147483647, %v1055_v19  ;;  %vm1076_vm1 = vweird.f32 %v1055_v19 }
 0x63e   :  { %v1058_v22 = vsub.f32 1.0, %v1057_v20 }
 0x63f   :  { %v1083_v39 = vor.u32 1.1754944e-38, %v1082_v34  ;;  %vm1081_vm3 = vcmp.eq.f32.partialorder %v1080_v36, 8.507059e+37 }
 0x640   :  { %v1059_v50 = vmul.f32 %v1321_v18, %v1058_v22 }
 0x642   :  { %v1060_v25 = vadd.f32 %v1321_v18, %v1059_v50 }
 0x643   :  { %v1323_v29 = vpop.eup %1322 }
 0x644   :  { %v1064_v30 = vsel %vm1063_vm14, %v1321_v18, %v1060_v25  ;;  %v1072_v31 = vmul.f32 %v1323_v29, %v1055_v19  ;;  %vm1077_vm0 = vweird.f32 %v1323_v29 }
 0x645   :  { %v1069_v32 = vsel %vm1066_vm15, %v1068_v37, %v1064_v30  ;;  %vm1078_vm2 = vmor %vm1076_vm1, %vm1077_vm0 }
 0x646   :  { %1088 = vperm.xlu0 %1307, %v1069_v32   ;;  %v1073_v33 = vsub.f32 1.0, %v1072_v31 }
 0x648   :  { %v1074_v35 = vmul.f32 %v1323_v29, %v1073_v33 }
 0x64a   :  { %v1075_v38 = vadd.f32 %v1323_v29, %v1074_v35 }
 0x64c   :  { %v1079_v41 = vsel %vm1078_vm2, %v1323_v29, %v1075_v38 }
 0x64d   :  { %v1084_v42 = vsel %vm1081_vm3, %v1083_v39, %v1079_v41 }
 0x64e   :  { %1093 = vperm.xlu1 %1308, %v1084_v42  }
 0x6b8   :  { %v1089_v43 = vpop.permute.xlu0 %1088 }
 0x6b9   :  { %1096 = vst [vmem:[%s1684_s4] sm:$0xff] %v1089_v43 }
 0x6c0   :  { %v1094_v44 = vpop.permute.xlu1 %1093 }
 0x6c1   :  { %1097 = vst [vmem:[%s1684_s4 + $0x8] sm:$0xff] %v1094_v44 }
 0x6c2   :  { %1102 = vsyncpa [#allocation3], 1 }

</bundles_post_ra>
